<compile_context>
chip_gen: v7x
topology: tpu7x:2x2x1
jax: 0.10.0
libtpu: 0.0.40
codegen_flags: <defaults>
</compile_context>

<pallas_src>
import jax
import jax.numpy as jnp
from jax.experimental import pallas as pl
from jax.experimental.pallas import tpu as pltpu


P = 8              # batch rows packed into one lane-row (8 sublane groups)
H1, H2, OUT = 32, 8, 1


def _round_up(n, m):
    return ((n + m - 1) // m) * m


def _mlp_kernel(x_ref, w1_ref, b1_ref, w2_ref, b2_ref, w3_ref, b3_ref, o_ref):
    # x_ref: (TBp, P*D) -- 8 batch rows per packed row, lane-dense (128 for D=16).
    x = x_ref[...]

    # fc1 + ReLU: block-diagonal weights -> native MXU K=P*D, N=P*32 pass,
    # f32 accumulation, f32 elementwise tail (legal on v5e: no bf16 VPU/EUP).
    h1 = jnp.dot(x, w1_ref[...], preferred_element_type=jnp.float32) + b1_ref[...]
    h1 = jnp.maximum(h1, 0.0)                                   # (TBp, P*32)

    # dropout1(p=0.6): identity in inference mode.
    # TODO(synk): training-mode dropout (pltpu.prng_seed / prng_random_bits mask
    # + 1/(1-p) scaling) not emitted; kernel targets eval-mode forward only.

    # fc2 + ReLU
    h2 = jnp.dot(h1, w2_ref[...], preferred_element_type=jnp.float32) + b2_ref[...]
    h2 = jnp.maximum(h2, 0.0)                                   # (TBp, P*8)

    # fc3 + Sigmoid (EUP exp path, numerically safe).
    logits = jnp.dot(h2, w3_ref[...], preferred_element_type=jnp.float32) + b3_ref[...]
    # Packed (TBp, P) store: 8 useful lanes per vreg (8x denser than a (TB,1)
    # masked store); output traffic is only ~1/16 of the x read traffic.
    o_ref[...] = jax.nn.sigmoid(logits).astype(o_ref.dtype)


def init_params(key, input_dim):
    """nn.Linear-style init: fc1(D->32), fc2(32->8), fc3(8->1). Weights stored
    transposed to (in, out) for the x @ W convention, biases as (1, out)."""
    ks = jax.random.split(key, 6)

    def lin(kw, kb, fan_in, fan_out):
        bound = 1.0 / jnp.sqrt(fan_in)
        w = jax.random.uniform(kw, (fan_in, fan_out), jnp.float32, -bound, bound)
        b = jax.random.uniform(kb, (1, fan_out), jnp.float32, -bound, bound)
        return w, b

    w1, b1 = lin(ks[0], ks[1], input_dim, H1)
    w2, b2 = lin(ks[2], ks[3], H1, H2)
    w3, b3 = lin(ks[4], ks[5], H2, OUT)
    return {"w1": w1, "b1": b1, "w2": w2, "b2": b2, "w3": w3, "b3": b3}


def prepare_params(params, *, x_dtype=jnp.float32):
    """One-time (per model, not per call) repack: block-diagonal weights
    kron(I_P, W) and P-tiled biases, so the kernel keeps the batch packed into
    lanes end-to-end. w1 is cast to the activation dtype HERE (never per call),
    so a bf16 activation path costs no extra HBM pass."""
    def bd(w):
        return jnp.kron(jnp.eye(P, dtype=w.dtype), w)

    return {
        "w1": bd(params["w1"]).astype(x_dtype),   # (P*D,  P*32)
        "b1": jnp.tile(params["b1"], (1, P)),     # (1,    P*32) f32
        "w2": bd(params["w2"]),                   # (P*32, P*8)  f32 (tiny, resident)
        "b2": jnp.tile(params["b2"], (1, P)),
        "w3": bd(params["w3"]),                   # (P*8,  P*1)
        "b3": jnp.tile(params["b3"], (1, P)),
    }


def loan_approval_forward(x, packed_params, *, block_batch=32768):
    """x: (B, D) f32 or bf16. packed_params: output of prepare_params().

    Streams the batch in tiles of `block_batch` rows (default 32768 rows ->
    2 MiB f32 x tile at D=16, double-buffered by Pallas) so the fixed per-step
    cost is amortized at the HBM roofline. Weights/biases stay VMEM-resident via
    constant index maps. Ragged batches use a cdiv grid with a masked partial
    last block; the only pad is up to the 64-row pack quantum (zero-copy fast
    path when B % 64 == 0).
    """
    B, D = x.shape
    w1, b1, w2, b2, w3, b3 = (packed_params[k]
                              for k in ("w1", "b1", "w2", "b2", "w3", "b3"))

    quantum = 8 * P                               # 64 rows: free reshape + sublane align
    B_pad = _round_up(B, quantum)
    if B_pad != B:
        # At most 63 extra rows; callers with huge B should hand in B % 64 == 0
        # so this full-copy branch stays off the hot path.
        x = jnp.pad(x, ((0, B_pad - B), (0, 0)))
    Bp = B_pad // P
    xp = x.reshape(Bp, P * D)                     # free: contiguous row-major merge

    TB = min(_round_up(block_batch, quantum), B_pad)   # batch rows per grid step
    TBp = TB // P
    nb = pl.cdiv(Bp, TBp)                         # ragged last block handled by masking

    def resident(a):
        # Full-array block, same block every grid step -> stays in VMEM.
        return pl.BlockSpec(a.shape, lambda i: (0, 0))

    out = pl.pallas_call(
        _mlp_kernel,
        grid=(nb,),
        in_specs=[
            pl.BlockSpec((TBp, P * D), lambda i: (i, 0)),   # streamed packed x tiles
            resident(w1), resident(b1),
            resident(w2), resident(b2),
            resident(w3), resident(b3),
        ],
        out_specs=pl.BlockSpec((TBp, P), lambda i: (i, 0)),
        out_shape=jax.ShapeDtypeStruct((Bp, P), jnp.float32),
        compiler_params=pltpu.CompilerParams(
            # v7x: shard the batch grid over both TensorCores.
            dimension_semantics=("parallel",),
            # Large tiles exceed the 16/32 MiB scoped-VMEM defaults; 48 MiB is
            # still well under v7x's 64 MiB/TC physical (v5e/v6e: 128 MiB).
            vmem_limit_bytes=48 * 1024 * 1024,
        ),
    )(xp, w1, b1, w2, b2, w3, b3)

    # (Bp, P) row-major order == batch order: free reshape back to (B, 1).
    return out.reshape(B_pad, 1)[:B]


def _reference(x, p):
    h1 = jnp.maximum(x @ p["w1"] + p["b1"], 0.0)
    h2 = jnp.maximum(h1 @ p["w2"] + p["b2"], 0.0)
    return jax.nn.sigmoid(h2 @ p["w3"] + p["b3"])


if __name__ == "__main__":
    key = jax.random.PRNGKey(0)
    k_x, k_p, k_big = jax.random.split(key, 3)

    batch, input_dim = 8, 16
    x = jax.random.normal(k_x, (batch, input_dim), dtype=jnp.float32)
    params = init_params(k_p, input_dim)
    packed = prepare_params(params)

    # f32 path, small batch (single grid step)
    out = jax.block_until_ready(loan_approval_forward(x, packed))
    ref = _reference(x, params)
    assert out.shape == (batch, 1)
    assert jnp.allclose(out, ref, atol=2e-5, rtol=2e-5)

    # multi-step grid + pack-quantum padding (exercises pipelining / index maps)
    big_b = 1000
    x_big = jax.random.normal(k_big, (big_b, input_dim), dtype=jnp.float32)
    ref_big = _reference(x_big, params)
    out_big = jax.block_until_ready(
        loan_approval_forward(x_big, packed, block_batch=256))
    assert out_big.shape == (big_b, 1)
    assert jnp.allclose(out_big, ref_big, atol=2e-5, rtol=2e-5)

    # ragged cdiv grid: tile does not divide the packed batch (partial last block)
    out_rag = jax.block_until_ready(
        loan_approval_forward(x_big, packed, block_batch=384))
    assert jnp.allclose(out_rag, ref_big, atol=2e-5, rtol=2e-5)

    # bf16 activation path: caller supplies bf16 x, w1 cast once at prep time
    packed_bf16 = prepare_params(params, x_dtype=jnp.bfloat16)
    out_bf16 = jax.block_until_ready(
        loan_approval_forward(x_big.astype(jnp.bfloat16), packed_bf16,
                              block_batch=256))
    assert out_bf16.shape == (big_b, 1)
    assert jnp.allclose(out_bf16, ref_big, atol=3e-2, rtol=3e-2)

    print("KERNEL_OK")
</pallas_src>

<mosaic_0001>
module attributes {stable_mosaic.version = 11 : i64} {
  func.func @_mlp_kernel(%arg0: i32, %arg1: memref<8x128xf32, #tpu.memory_space<vmem>>, %arg2: memref<128x256xf32, #tpu.memory_space<vmem>>, %arg3: memref<1x256xf32, #tpu.memory_space<vmem>>, %arg4: memref<256x64xf32, #tpu.memory_space<vmem>>, %arg5: memref<1x64xf32, #tpu.memory_space<vmem>>, %arg6: memref<64x8xf32, #tpu.memory_space<vmem>>, %arg7: memref<1x8xf32, #tpu.memory_space<vmem>>, %arg8: memref<8x8xf32, #tpu.memory_space<vmem>>) attributes {dimension_semantics = [#tpu.dimension_semantics<parallel>], iteration_bounds = array<i64: 1>, scalar_prefetch = 0 : i64, scratch_operands = 0 : i64, tpu.core_type = #tpu.core_type<tc>, window_params = [{transform_indices = @transform_0, window_bounds = array<i64: 8, 128>}, {pipeline_mode = #tpu.pipeline_mode<synchronous>, transform_indices = @transform_1, window_bounds = array<i64: 128, 256>}, {pipeline_mode = #tpu.pipeline_mode<synchronous>, transform_indices = @transform_2, window_bounds = array<i64: 1, 256>}, {pipeline_mode = #tpu.pipeline_mode<synchronous>, transform_indices = @transform_3, window_bounds = array<i64: 256, 64>}, {pipeline_mode = #tpu.pipeline_mode<synchronous>, transform_indices = @transform_4, window_bounds = array<i64: 1, 64>}, {pipeline_mode = #tpu.pipeline_mode<synchronous>, transform_indices = @transform_5, window_bounds = array<i64: 64, 8>}, {pipeline_mode = #tpu.pipeline_mode<synchronous>, transform_indices = @transform_6, window_bounds = array<i64: 1, 8>}, {transform_indices = @transform_7, window_bounds = array<i64: 8, 8>}]} {
    %c0 = arith.constant 0 : index
    %c0_0 = arith.constant 0 : index
    %0 = vector.load %arg1[%c0, %c0_0] : memref<8x128xf32, #tpu.memory_space<vmem>>, vector<8x128xf32>
    %c0_1 = arith.constant 0 : index
    %c0_2 = arith.constant 0 : index
    %1 = vector.load %arg2[%c0_1, %c0_2] : memref<128x256xf32, #tpu.memory_space<vmem>>, vector<128x256xf32>
    %cst = arith.constant dense<0.000000e+00> : vector<8x256xf32>
    %2 = tpu.matmul %0, %1, %cst {dimension_numbers = #tpu.dot_dimension_numbers<[1], [0], [0], [1], [0, 0, 1, 1], [], []>} : vector<8x128xf32>, vector<128x256xf32>, vector<8x256xf32> -> vector<8x256xf32>
    %c0_3 = arith.constant 0 : index
    %c0_4 = arith.constant 0 : index
    %3 = vector.load %arg3[%c0_3, %c0_4] : memref<1x256xf32, #tpu.memory_space<vmem>>, vector<1x256xf32>
    %4 = vector.broadcast %3 : vector<1x256xf32> to vector<8x256xf32>
    %5 = arith.addf %2, %4 : vector<8x256xf32>
    %cst_5 = arith.constant 0.000000e+00 : f32
    %6 = vector.broadcast %cst_5 : f32 to vector<8x256xf32>
    %7 = arith.maximumf %5, %6 : vector<8x256xf32>
    %c0_6 = arith.constant 0 : index
    %c0_7 = arith.constant 0 : index
    %8 = vector.load %arg4[%c0_6, %c0_7] : memref<256x64xf32, #tpu.memory_space<vmem>>, vector<256x64xf32>
    %cst_8 = arith.constant dense<0.000000e+00> : vector<8x64xf32>
    %9 = tpu.matmul %7, %8, %cst_8 {dimension_numbers = #tpu.dot_dimension_numbers<[1], [0], [0], [1], [0, 0, 1, 1], [], []>} : vector<8x256xf32>, vector<256x64xf32>, vector<8x64xf32> -> vector<8x64xf32>
    %c0_9 = arith.constant 0 : index
    %c0_10 = arith.constant 0 : index
    %10 = vector.load %arg5[%c0_9, %c0_10] : memref<1x64xf32, #tpu.memory_space<vmem>>, vector<1x64xf32>
    %11 = vector.broadcast %10 : vector<1x64xf32> to vector<8x64xf32>
    %12 = arith.addf %9, %11 : vector<8x64xf32>
    %cst_11 = arith.constant 0.000000e+00 : f32
    %13 = vector.broadcast %cst_11 : f32 to vector<8x64xf32>
    %14 = arith.maximumf %12, %13 : vector<8x64xf32>
    %c0_12 = arith.constant 0 : index
    %c0_13 = arith.constant 0 : index
    %15 = vector.load %arg6[%c0_12, %c0_13] : memref<64x8xf32, #tpu.memory_space<vmem>>, vector<64x8xf32>
    %cst_14 = arith.constant dense<0.000000e+00> : vector<8x8xf32>
    %16 = tpu.matmul %14, %15, %cst_14 {dimension_numbers = #tpu.dot_dimension_numbers<[1], [0], [0], [1], [0, 0, 1, 1], [], []>} : vector<8x64xf32>, vector<64x8xf32>, vector<8x8xf32> -> vector<8x8xf32>
    %c0_15 = arith.constant 0 : index
    %c0_16 = arith.constant 0 : index
    %17 = vector.load %arg7[%c0_15, %c0_16] : memref<1x8xf32, #tpu.memory_space<vmem>>, vector<1x8xf32>
    %18 = vector.broadcast %17 : vector<1x8xf32> to vector<8x8xf32>
    %19 = arith.addf %16, %18 : vector<8x8xf32>
    %20 = arith.negf %19 : vector<8x8xf32>
    %21 = math.exp %20 : vector<8x8xf32>
    %cst_17 = arith.constant 1.000000e+00 : f32
    %22 = vector.broadcast %cst_17 : f32 to vector<8x8xf32>
    %23 = arith.addf %22, %21 : vector<8x8xf32>
    %24 = arith.divf %22, %23 : vector<8x8xf32>
    %c0_18 = arith.constant 0 : index
    %c0_19 = arith.constant 0 : index
    %25 = vector.load %arg8[%c0_18, %c0_19] : memref<8x8xf32, #tpu.memory_space<vmem>>, vector<8x8xf32>
    tpu.vector_store %arg8[%c0_18, %c0_19], %24 {strides = array<i32>} : memref<8x8xf32, #tpu.memory_space<vmem>>, vector<8x8xf32>,
    return
  }
  func.func @transform_0(%arg0: i32) -> (i32, i32) {
    %c0_i32 = arith.constant 0 : i32
    %c0_i32_0 = arith.constant 0 : i32
    return %arg0, %c0_i32 : i32, i32
  }
  func.func @transform_1(%arg0: i32) -> (i32, i32) {
    %c0_i32 = arith.constant 0 : i32
    %c0_i32_0 = arith.constant 0 : i32
    %c0_i32_1 = arith.constant 0 : i32
    return %c0_i32, %c0_i32_0 : i32, i32
  }
  func.func @transform_2(%arg0: i32) -> (i32, i32) {
    %c0_i32 = arith.constant 0 : i32
    %c0_i32_0 = arith.constant 0 : i32
    %c0_i32_1 = arith.constant 0 : i32
    return %c0_i32, %c0_i32_0 : i32, i32
  }
  func.func @transform_3(%arg0: i32) -> (i32, i32) {
    %c0_i32 = arith.constant 0 : i32
    %c0_i32_0 = arith.constant 0 : i32
    %c0_i32_1 = arith.constant 0 : i32
    return %c0_i32, %c0_i32_0 : i32, i32
  }
  func.func @transform_4(%arg0: i32) -> (i32, i32) {
    %c0_i32 = arith.constant 0 : i32
    %c0_i32_0 = arith.constant 0 : i32
    %c0_i32_1 = arith.constant 0 : i32
    return %c0_i32, %c0_i32_0 : i32, i32
  }
  func.func @transform_5(%arg0: i32) -> (i32, i32) {
    %c0_i32 = arith.constant 0 : i32
    %c0_i32_0 = arith.constant 0 : i32
    %c0_i32_1 = arith.constant 0 : i32
    return %c0_i32, %c0_i32_0 : i32, i32
  }
  func.func @transform_6(%arg0: i32) -> (i32, i32) {
    %c0_i32 = arith.constant 0 : i32
    %c0_i32_0 = arith.constant 0 : i32
    %c0_i32_1 = arith.constant 0 : i32
    return %c0_i32, %c0_i32_0 : i32, i32
  }
  func.func @transform_7(%arg0: i32) -> (i32, i32) {
    %c0_i32 = arith.constant 0 : i32
    %c0_i32_0 = arith.constant 0 : i32
    return %arg0, %c0_i32 : i32, i32
  }
}

</mosaic_0001>

<bundles_post_ra>
// kernel: tpu_custom_call.1
= control target key start
LH: loop header
LB: loop body
LE: loop exit
PB: predicated region body
PF: predicated region fallthrough
CT: control target
= control target key end

     0   :  { %v541_v7 = vmov 0.0   ;;  %s827_s0 = inlined_call_operand.vmem [shape: f32[8,128], index: 0, kind: input, shape index: {}]   ;;  %s828_s1 = inlined_call_operand.vmem [shape: f32[128,256], index: 1, kind: input, shape index: {}]   ;;  %s829_s2 = inlined_call_operand.vmem [shape: f32[1,256], index: 2, kind: input, shape index: {}]   ;;  %s830_s3 = inlined_call_operand.vmem [shape: f32[256,64], index: 3, kind: input, shape index: {}]   ;;  %s831_s4 = inlined_call_operand.vmem [shape: f32[1,64], index: 4, kind: input, shape index: {}]   ;;  %s832_s5 = inlined_call_operand.vmem [shape: f32[64,8], index: 5, kind: input, shape index: {}]   ;;  %s833_s6 = inlined_call_operand.vmem [shape: f32[1,8], index: 6, kind: input, shape index: {}]   ;;  %s834_s7 = inlined_call_operand.hbm [shape: f32[8,8], index: 7, kind: output, shape index: {}]  }
   0x1   :  { %v29_v0 = vld [vmem:[%s828_s1 + $0x8] sm:$0xff]  ;;  %v31_v1 = vld [vmem:[%s828_s1 + $0x18] sm:$0xff]  ;;  %v28_v2 = vld [vmem:[%s828_s1] sm:$0xff]  ;;  %136 = vmatprep.mubr.f32.mxu0 %v541_v7 }
   0x2   :  { %v433_v3 = vpack.c.bf16 %v31_v1, %v29_v0  ;;  %v30_v4 = vld [vmem:[%s828_s1 + $0x10] sm:$0xff]  ;;  %v33_v5 = vld [vmem:[%s828_s1 + $0x28] sm:$0xff]  ;;  %v35_v6 = vld [vmem:[%s828_s1 + $0x38] sm:$0xff] }
   0x3   :  { %v435_v8 = vpack.c.bf16 %v30_v4, %v28_v2  ;;  %v437_v9 = vpack.c.bf16 %v35_v6, %v33_v5  ;;  %v32_v10 = vld [vmem:[%s828_s1 + $0x20] sm:$0xff]  ;;  %v34_v11 = vld [vmem:[%s828_s1 + $0x30] sm:$0xff]  ;;  %v37_v12 = vld [vmem:[%s828_s1 + $0x48] sm:$0xff] }
   0x4   :  { %434 = vmatprep.subr.bf16.mxu0 %v433_v3  ;;  %v39_v13 = vld [vmem:[%s828_s1 + $0x58] sm:$0xff]  ;;  %v439_v14 = vpack.c.bf16 %v34_v11, %v32_v10  ;;  %v36_v16 = vld [vmem:[%s828_s1 + $0x40] sm:$0xff]  ;;  %v38_v17 = vld [vmem:[%s828_s1 + $0x50] sm:$0xff] }
   0x5   :  { %436 = vmatpush1.bf16.msra.mxu0 %v435_v8  ;;  %v441_v15 = vpack.c.bf16 %v39_v13, %v37_v12  ;;  %v41_v18 = vld [vmem:[%s828_s1 + $0x68] sm:$0xff]  ;;  %v43_v19 = vld [vmem:[%s828_s1 + $0x78] sm:$0xff]  ;;  %v443_v20 = vpack.c.bf16 %v38_v17, %v36_v16  ;;  %v40_v22 = vld [vmem:[%s828_s1 + $0x60] sm:$0xff] }
   0x6   :  { %438 = vmatprep.subr.bf16.mxu0 %v437_v9  ;;  %v445_v21 = vpack.c.bf16 %v43_v19, %v41_v18  ;;  %v42_v23 = vld [vmem:[%s828_s1 + $0x70] sm:$0xff]  ;;  %v45_v24 = vld [vmem:[%s828_s1 + $0x88] sm:$0xff]  ;;  %v47_v25 = vld [vmem:[%s828_s1 + $0x98] sm:$0xff] }
   0x7   :  { %v44_v26 = vld [vmem:[%s828_s1 + $0x80] sm:$0xff]  ;;  %v46_v27 = vld [vmem:[%s828_s1 + $0x90] sm:$0xff]  ;;  %v162_v29 = vld [vmem:[%s830_s3 + $0x88] sm:$0xff]  ;;  %v447_v31 = vpack.c.bf16 %v42_v23, %v40_v22  ;;  %v449_v36 = vpack.c.bf16 %v47_v25, %v45_v24 }
   0x8   :  { %v161_v28 = vld [vmem:[%s830_s3 + $0x80] sm:$0xff]  ;;  %v146_v33 = vld [vmem:[%s830_s3 + $0x8] sm:$0xff]  ;;  %v163_v34 = vld [vmem:[%s830_s3 + $0x90] sm:$0xff]  ;;  %v451_v46 = vpack.c.bf16 %v46_v27, %v44_v26 }
   0x9   :  { %440 = vmatpush1.bf16.msra.mxu0 %v439_v14  ;;  %v145_v30 = vld [vmem:[%s830_s3] sm:$0xff]  ;;  %v465_v32 = vpack.c.bf16 %v162_v29, %v161_v28  ;;  %v164_v35 = vld [vmem:[%s830_s3 + $0x98] sm:$0xff]  ;;  %v147_v39 = vld [vmem:[%s830_s3 + $0x10] sm:$0xff] }
   0xa   :  { %442 = vmatprep.subr.bf16.mxu0 %v441_v15  ;;  %v467_v37 = vpack.c.bf16 %v146_v33, %v145_v30  ;;  %v469_v38 = vpack.c.bf16 %v164_v35, %v163_v34  ;;  %v148_v40 = vld [vmem:[%s830_s3 + $0x18] sm:$0xff]  ;;  %v165_v41 = vld [vmem:[%s830_s3 + $0xa0] sm:$0xff]  ;;  %v49_v42 = vld [vmem:[%s828_s1 + $0xa8] sm:$0xff] }
   0xb   :  { %v51_v43 = vld [vmem:[%s828_s1 + $0xb8] sm:$0xff]  ;;  %466 = vmatprep.subr.bf16.mxu1 %v465_v32  ;;  %v166_v44 = vld [vmem:[%s830_s3 + $0xa8] sm:$0xff]  ;;  %v471_v45 = vpack.c.bf16 %v148_v40, %v147_v39  ;;  %v48_v47 = vld [vmem:[%s828_s1 + $0xa0] sm:$0xff] }
   0xc   :  { %468 = vmatpush3.bf16.msra.mxu1 %v467_v37  ;;  %v473_v48 = vpack.c.bf16 %v166_v44, %v165_v41  ;;  %v149_v49 = vld [vmem:[%s830_s3 + $0x20] sm:$0xff]  ;;  %v150_v50 = vld [vmem:[%s830_s3 + $0x28] sm:$0xff]  ;;  %v453_v51 = vpack.c.bf16 %v51_v43, %v49_v42  ;;  %v50_v52 = vld [vmem:[%s828_s1 + $0xb0] sm:$0xff] }
   0xd   :  { %444 = vmatpush1.bf16.msra.mxu0 %v443_v20  ;;  %470 = vmatprep.subr.bf16.mxu1 %v469_v38  ;;  %v167_v53 = vld [vmem:[%s830_s3 + $0xb0] sm:$0xff]  ;;  %v168_v54 = vld [vmem:[%s830_s3 + $0xb8] sm:$0xff]  ;;  %v53_v55 = vld [vmem:[%s828_s1 + $0xc8] sm:$0xff]  ;;  %v475_v58 = vpack.c.bf16 %v150_v50, %v149_v49  ;;  %v455_v59 = vpack.c.bf16 %v50_v52, %v48_v47 }
   0xe   :  { %446 = vmatprep.subr.bf16.mxu0 %v445_v21  ;;  %v55_v56 = vld [vmem:[%s828_s1 + $0xd8] sm:$0xff]  ;;  %v52_v57 = vld [vmem:[%s828_s1 + $0xc0] sm:$0xff]  ;;  %v477_v60 = vpack.c.bf16 %v168_v54, %v167_v53  ;;  %v151_v61 = vld [vmem:[%s830_s3 + $0x30] sm:$0xff] }
   0xf   :  { %v152_v62 = vld [vmem:[%s830_s3 + $0x38] sm:$0xff] }
  0x10   :  { %472 = vmatpush3.bf16.msra.mxu1 %v471_v45 }
  0x11   :  { %448 = vmatpush1.bf16.msra.mxu0 %v447_v31  ;;  %474 = vmatprep.subr.bf16.mxu1 %v473_v48 }
  0x12   :  { %450 = vmatprep.subr.bf16.mxu0 %v449_v36 }
  0x15   :  { %452 = vmatpush1.bf16.msra.mxu0 %v451_v46 }
  0x16   :  { %12 = vsyncpa [#allocation3], 0  ;;  %454 = vmatprep.subr.bf16.mxu0 %v453_v51  ;;  %v457_v63 = vpack.c.bf16 %v55_v56, %v53_v55  ;;  %v54_v0 = vld [vmem:[%s828_s1 + $0xd0] sm:$0xff]  ;;  %v169_v1 = vld [vmem:[%s830_s3 + $0xc0] sm:$0xff]  ;;  %476 = vmatpush3.bf16.msra.mxu1 %v475_v58  ;;  %v479_v5 = vpack.c.bf16 %v152_v62, %v151_v61  ;;  %v542_v38 = vmov 0.0|0.0   ;;  %v62_v42 = vlaneseq }
  0x17   :  { %v170_v2 = vld [vmem:[%s830_s3 + $0xc8] sm:$0xff]  ;;  %v59_v4 = vld [vmem:[%s828_s1 + $0xf8] sm:$0xff]  ;;  %v459_v6 = vpack.c.bf16 %v54_v0, %v52_v57  ;;  %v56_v8 = vld [vmem:[%s828_s1 + $0xe0] sm:$0xff]  ;;  %478 = vmatprep.subr.bf16.mxu1 %v477_v60  ;;  %vm543_vm0 = vmmov 0   ;;  %vm270_vm1 = vcmask 523264   ;;  %vm350_vm2 = vcmask 64512  }
  0x18   :  { %v57_v3 = vld [vmem:[%s828_s1 + $0xe8] sm:$0xff]  ;;  %v481_v9 = vpack.c.bf16 %v170_v2, %v169_v1  ;;  %v153_v10 = vld [vmem:[%s830_s3 + $0x40] sm:$0xff]  ;;  %v58_v13 = vld [vmem:[%s828_s1 + $0xf0] sm:$0xff]  ;;  %v63_v43 = vshrl.u32 %v62_v42, 7 }
  0x19   :  { %456 = vmatpush1.bf16.msra.mxu0 %v455_v59  ;;  %v154_v11 = vld [vmem:[%s830_s3 + $0x48] sm:$0xff]  ;;  %v461_v12 = vpack.c.bf16 %v59_v4, %v57_v3  ;;  %v171_v14 = vld [vmem:[%s830_s3 + $0xd0] sm:$0xff]  ;;  %v172_v15 = vld [vmem:[%s830_s3 + $0xd8] sm:$0xff]  ;;  %v463_v17 = vpack.c.bf16 %v58_v13, %v56_v8 }
  0x1a   :  { %458 = vmatprep.subr.bf16.mxu0 %v457_v63  ;;  %480 = vmatpush3.bf16.msra.mxu1 %v479_v5  ;;  %v483_v16 = vpack.c.bf16 %v154_v11, %v153_v10  ;;  %v485_v18 = vpack.c.bf16 %v172_v15, %v171_v14  ;;  %v155_v19 = vld [vmem:[%s830_s3 + $0x50] sm:$0xff]  ;;  %v156_v20 = vld [vmem:[%s830_s3 + $0x58] sm:$0xff]  ;;  %v173_v21 = vld [vmem:[%s830_s3 + $0xe0] sm:$0xff]  ;;  %v64_v44 = vsub.s32 0, %v63_v43  ;;  %v68_v46 = vsub.s32 1, %v63_v43 }
  0x1b   :  { %482 = vmatprep.subr.bf16.mxu1 %v481_v9  ;;  %v174_v22 = vld [vmem:[%s830_s3 + $0xe8] sm:$0xff]  ;;  %v487_v23 = vpack.c.bf16 %v156_v20, %v155_v19  ;;  %v27_v24 = vld [vmem:[%s827_s0] sm:$0xff]  ;;  %v175_v29 = vld [vmem:[%s830_s3 + $0xf0] sm:$0xff] }
  0x1c   :  { %v489_v25 = vpack.c.bf16 %v174_v22, %v173_v21  ;;  %v157_v26 = vld [vmem:[%s830_s3 + $0x60] sm:$0xff]  ;;  %v158_v27 = vld [vmem:[%s830_s3 + $0x68] sm:$0xff]  ;;  %v176_v30 = vld [vmem:[%s830_s3 + $0xf8] sm:$0xff] }
  0x1d   :  { %460 = vmatpush1.bf16.msra.mxu0 %v459_v6  ;;  %v491_v28 = vpack.c.bf16 %v158_v27, %v157_v26  ;;  %v493_v31 = vpack.c.bf16 %v176_v30, %v175_v29  ;;  %v159_v32 = vld [vmem:[%s830_s3 + $0x70] sm:$0xff]  ;;  %v160_v33 = vld [vmem:[%s830_s3 + $0x78] sm:$0xff]  ;;  %v255_v35 = vld [vmem:[%s832_s5] sm:$0xff] }
  0x1e   :  { %462 = vmatprep.subr.bf16.mxu0 %v461_v12  ;;  %484 = vmatpush3.bf16.msra.mxu1 %v483_v16  ;;  %v495_v34 = vpack.c.bf16 %v160_v33, %v159_v32  ;;  %v256_v36 = vld [vmem:[%s832_s5 + $0x8] sm:$0xff]  ;;  %v257_v37 = vld [vmem:[%s832_s5 + $0x10] sm:$0xff]  ;;  %v258_v40 = vld [vmem:[%s832_s5 + $0x18] sm:$0xff] }
  0x1f   :  { %486 = vmatprep.subr.bf16.mxu1 %v485_v18  ;;  %v498_v39 = vpack.c.bf16 %v256_v36, %v255_v35  ;;  %v501_v41 = vpack.c.bf16 %v258_v40, %v257_v37  ;;  %v60_v45 = vld [vmem:[%s829_s2] sm:$0x3]  ;;  %v260_v56 = vld [vmem:[%s832_s5 + $0x28] sm:$0xff]  ;;  %v261_v58 = vld [vmem:[%s832_s5 + $0x30] sm:$0xff] }
  0x20   :  { %v65_v47 = vrot.slane %v60_v45, %v64_v44  ;;  %v69_v48 = vrot.slane %v60_v45, %v68_v46  ;;  %v259_v55 = vld [vmem:[%s832_s5 + $0x20] sm:$0xff]  ;;  %v262_v59 = vld [vmem:[%s832_s5 + $0x38] sm:$0xff]  ;;  %s544_s5 = smov [#allocation2]  }
  0x21   :  { %464 = vmatpush1.bf16.msra.mxu0 %v463_v17  ;;  %v504_v57 = vpack.c.bf16 %v260_v56, %v259_v55  ;;  %v507_v60 = vpack.c.bf16 %v262_v59, %v261_v58  ;;  %v366_v62 = vld [vmem:[%s831_s4] ss:$0 sm:$0xff]  ;;  %s358_s4 = sshll.u32 %s544_s5, 4  ;;  %s359_s4 = int_to_ptr.vmem [resolvable:$true] %s358_s4 }
  0x22   :  { %488 = vmatpush3.bf16.msra.mxu1 %v487_v23  ;;  %497 = vmatprep.subr.bf16.mxu0 %v542_v38  ;;  %v367_v3 = vld [vmem:[%s833_s6] ss:$0 sm:$0xff]  ;;  %s517_s9 = scalar_lea.vmem %s359_s4, 128  ;;  %p522_p1 = scmp.lt.s32.totalorder %s359_s4, %s359_s4 }
  0x23   :  { %490 = vmatprep.subr.bf16.mxu1 %v489_v25  ;;  %p518_p0 = scmp.ne.s32.totalorder %s359_s4, %s517_s9  ;;  %p523_p2 = scmp.lt.s32.totalorder %s517_s9, %s517_s9 }
  0x24   :  { %137 = vmatmul.mubr.f32.vlgmr.msra.gmra.mrb[0].mxu0 %v27_v24 }
  0x25   :  { %499 = vmatpush3.bf16.msra.mxu0 %v498_v39  ;;  %430 = vmatprep.mubr.msk.f32.mxu0 %vm543_vm0, %v541_v7  ;;  %p524_p3 = por %p523_p2, %p522_p1 }
  0x26   :  { %492 = vmatpush3.bf16.msra.mxu1 %v491_v28  ;;  %500 = vmatprep.subr.bf16.mxu0 %v542_v38 }
  0x27   :  { %494 = vmatprep.subr.bf16.mxu1 %v493_v31  ;;  %p525_p4 = pnand %p524_p3, %p518_p0 }
  0x29   :  { %502 = vmatpush3.bf16.msra.mxu0 %v501_v41 }
  0x2a   :  { %496 = vmatpush3.bf16.msra.mxu1 %v495_v34  ;;  %503 = vmatprep.subr.bf16.mxu0 %v542_v38 }
  0x2d   :  { %505 = vmatpush3.bf16.msra.mxu0 %v504_v57 }
  0x2e   :  { %506 = vmatprep.subr.bf16.mxu0 %v542_v38 }
  0x31   :  { %508 = vmatpush3.bf16.msra.mxu0 %v507_v60 }
  0xf7   :  { %v138_v49 = vpop.f32.mrb[0].mxu0 }
  0xf8   :  { %v139_v50 = vadd.f32 %v138_v49, %v65_v47  ;;  %v140_v51 = vpop.f32.mrb[1].mxu0 }
  0xf9   :  { %v141_v52 = vadd.f32 %v140_v51, %v69_v48 }
  0xfa   :  { %v143_v54 = vmax.f32 %v139_v50, 0.0 }
  0xfb   :  { %v144_v53 = vmax.f32 %v141_v52, 0.0 }
  0xfd   :  { %248 = vmatprep.mubr.f32.mxu1 %v144_v53 }
  0xfe   :  { %249 = vmatmul.mubr.f32.vlgmr.msra.gmra.mrb[0].mxu1 %v143_v54 }
 0x1d1   :  { %v402_v61 = vpop.f32.mrb[0].mxu1 }
 0x1d2   :  { %v403_v63 = vpop.f32.mrb[1].mxu1 }
 0x1d3   :  { %v404_v0 = vadd.f32 %v403_v63, %v402_v61 }
 0x1d5   :  { %v251_v1 = vadd.f32 %v404_v0, %v366_v62 }
 0x1d7   :  { %v254_v2 = vmax.f32 %v251_v1, 0.0 }
 0x1d9   :  { %431 = vmatmul.mubr.msk.f32.vlgmr.msra.gmra.mrb[2].mxu0 %vm270_vm1, %v254_v2 }
 0x2ac   :  { %v340_v4 = vpop.f32.mrb[2].mxu0 }
 0x2ad   :  { %v341_v5 = vadd.f32 %v367_v3, %v340_v4  ;;  %v432_v6 = vpop.f32.mrb[3].mxu0 }
 0x2af   :  { %v369_v8 = vmul.f32 -1.442695, %v341_v5 }
 0x2b1   :  { %513 = vpow2.f32 %v369_v8 }
 0x2bb   :  { %v514_v7 = vpop.eup %513 }
 0x2bc   :  { %v347_v9 = vadd.f32 1.0, %v514_v7 }
 0x2be   :  { %515 = vrcp.f32 %v347_v9 }
 0x2c8   :  { %v516_v10 = vpop.eup %515 }
 0x2c9   :  { %351 = vst.msk [vmem:[#allocation2] sm:$0xff] %vm350_vm2, %v516_v10 }
 0x2ca   :  { %528 = shalt.err (!%p525_p4)
}
 0x2cb   :  { %s529_s11 = scalar_lea.hbm %s834_s7, 128 }
 0x2cc   :  { %p530_p5 = scmp.ne.s32.totalorder %s834_s7, %s529_s11  ;;  %p533_p6 = scmp.lt.u32.totalorder %s529_s11, %s834_s7 }
 0x2ce   :  { %p535_p7 = pnand %p533_p6, %p530_p5 }
 0x2d0   :  { %538 = shalt.err (!%p535_p7)
}
 0x2d1   :  { %361 = dma.vmem_to_hbm [thread:$0]  %s359_s4, 128, %s834_s7, [#allocation3]  }
 0x2d2   :  { %539 = dma.done.wait [#allocation3], 128  }
 0x2d3   :  { %540 = vsyncadd [#allocation3], 4294967168 }
 0x2d4   :  { %365 = vsyncpa [#allocation3], 1 }

</bundles_post_ra>
